<compile_context>
chip_gen: v7x
topology: tpu7x:2x2x1
jax: 0.10.0
libtpu: 0.0.40
codegen_flags: <defaults>
</compile_context>

<pallas_src>
import jax
import jax.numpy as jnp
from jax.experimental import pallas as pl
from jax.experimental.pallas import tpu as pltpu


def rnn_kernel(x_ref, wih_ref, whh_ref, b_ref, wout_ref, bout_ref, out_ref):
    # x_ref: (S*Bp, D) -- already flattened & batch-padded in the wrapper.
    SB, D = x_ref.shape
    H = whh_ref.shape[0]
    Bp = out_ref.shape[0]
    S = SB // Bp

    # Hoisted input projection: one (S*Bp, D) @ (D, H) matmul, fused bias
    # (b_ref already holds b_ih + b_hh, folded in the wrapper).
    xw = (jnp.dot(x_ref[...], wih_ref[...], preferred_element_type=jnp.float32)
          + b_ref[...])                                    # (S*Bp, H)

    # Serial tanh recurrence, fully unrolled (S is small & static).  h stays in
    # vector registers; each xw slice is an aligned whole-vreg block (Bp = 8k).
    h = jnp.zeros((Bp, H), jnp.float32)
    for t in range(S):
        pre = xw[t * Bp:(t + 1) * Bp, :] + jnp.dot(
            h, whh_ref[...], preferred_element_type=jnp.float32)
        h = jnp.tanh(pre)

    # Final linear layer + log-softmax over classes (dim=1), run once.
    logits = (jnp.dot(h, wout_ref[...], preferred_element_type=jnp.float32)
              + bout_ref[...])
    m = jnp.max(logits, axis=1, keepdims=True)
    lse = m + jnp.log(jnp.sum(jnp.exp(logits - m), axis=1, keepdims=True))
    out_ref[...] = (logits - lse).astype(out_ref.dtype)


def _rnn_forward_impl(inputs, params):
    S, B, D = inputs.shape
    H = params["w_hh"].shape[0]
    n_cls = params["w_out"].shape[0]

    # Pad batch to a full sublane group (multiple of 8) with zero rows; they
    # flow harmlessly through tanh / log-softmax and are sliced off below.
    Bp = max(8, ((B + 7) // 8) * 8)
    x = inputs if Bp == B else jnp.pad(inputs, ((0, 0), (0, Bp - B), (0, 0)))

    # Wrapper-side reshape (free view) instead of an in-kernel reshape.
    x2d = x.reshape(S * Bp, D)

    # Pre-transpose weights so the kernel computes x @ W^T as x @ Wt, and fold
    # the two RNN biases into a single (1, H) bias.
    wih_t = params["w_ih"].T                               # (D, H)
    whh_t = params["w_hh"].T                               # (H, H)
    wout_t = params["w_out"].T                             # (H, 5)
    b = (params["b_ih"] + params["b_hh"]).reshape(1, H)    # (1, H)
    bout = params["b_out"].reshape(1, n_cls)               # (1, 5)

    vmem = pl.BlockSpec(memory_space=pltpu.MemorySpace.VMEM)
    out = pl.pallas_call(
        rnn_kernel,
        out_shape=jax.ShapeDtypeStruct((Bp, n_cls), jnp.float32),
        in_specs=[vmem] * 6,
        out_specs=vmem,
    )(x2d, wih_t, whh_t, b, wout_t, bout)
    return out[:B]


rnn_forward = jax.jit(_rnn_forward_impl)


def make_params(key, input_dim, h, n_cls=5):
    """Deterministic uniform(-1/sqrt(h), 1/sqrt(h)) init (PyTorch-style shapes)."""
    ks = jax.random.split(key, 6)
    bound = 1.0 / jnp.sqrt(jnp.float32(h))
    u = lambda k, shape: jax.random.uniform(k, shape, jnp.float32, -bound, bound)
    return {
        "w_ih": u(ks[0], (h, input_dim)),
        "w_hh": u(ks[1], (h, h)),
        "b_ih": u(ks[2], (h,)),
        "b_hh": u(ks[3], (h,)),
        "w_out": u(ks[4], (n_cls, h)),
        "b_out": u(ks[5], (n_cls,)),
    }


def rnn_reference(inputs, params):
    """Pure-JAX reference matching torch.nn.RNN(tanh) + Linear + LogSoftmax."""
    S, B, D = inputs.shape
    H = params["w_hh"].shape[0]
    h = jnp.zeros((B, H), jnp.float32)
    for t in range(S):
        h = jnp.tanh(inputs[t] @ params["w_ih"].T + params["b_ih"]
                     + h @ params["w_hh"].T + params["b_hh"])
    logits = h @ params["w_out"].T + params["b_out"]
    return jax.nn.log_softmax(logits, axis=1)


if __name__ == "__main__":
    seq_len, batch, input_dim, hidden = 8, 2, 16, 32

    key = jax.random.PRNGKey(0)
    k_x, k_p = jax.random.split(key)
    inputs = jax.random.normal(k_x, (seq_len, batch, input_dim), jnp.float32)
    params = make_params(k_p, input_dim, hidden)

    out = rnn_forward(inputs, params)
    out = jax.block_until_ready(out)

    ref = rnn_reference(inputs, params)
    assert out.shape == (batch, 5)
    assert jnp.allclose(out, ref, atol=1e-5, rtol=1e-5), (out, ref)

    print("KERNEL_OK")
</pallas_src>

<mosaic_0001>
module attributes {stable_mosaic.version = 11 : i64} {
  func.func @rnn_kernel(%arg0: memref<64x16xf32, #tpu.memory_space<vmem>>, %arg1: memref<16x32xf32, #tpu.memory_space<vmem>>, %arg2: memref<32x32xf32, #tpu.memory_space<vmem>>, %arg3: memref<1x32xf32, #tpu.memory_space<vmem>>, %arg4: memref<32x5xf32, #tpu.memory_space<vmem>>, %arg5: memref<1x5xf32, #tpu.memory_space<vmem>>, %arg6: memref<8x5xf32, #tpu.memory_space<vmem>>) attributes {dimension_semantics = [], scalar_prefetch = 0 : i64, scratch_operands = 0 : i64, tpu.core_type = #tpu.core_type<tc>} {
    %c0 = arith.constant 0 : index
    %c0_0 = arith.constant 0 : index
    %0 = vector.load %arg0[%c0, %c0_0] : memref<64x16xf32, #tpu.memory_space<vmem>>, vector<64x16xf32>
    %c0_1 = arith.constant 0 : index
    %c0_2 = arith.constant 0 : index
    %1 = vector.load %arg1[%c0_1, %c0_2] : memref<16x32xf32, #tpu.memory_space<vmem>>, vector<16x32xf32>
    %cst = arith.constant dense<0.000000e+00> : vector<64x32xf32>
    %2 = tpu.matmul %0, %1, %cst {dimension_numbers = #tpu.dot_dimension_numbers<[1], [0], [0], [1], [0, 0, 1, 1], [], []>} : vector<64x16xf32>, vector<16x32xf32>, vector<64x32xf32> -> vector<64x32xf32>
    %c0_3 = arith.constant 0 : index
    %c0_4 = arith.constant 0 : index
    %3 = vector.load %arg3[%c0_3, %c0_4] : memref<1x32xf32, #tpu.memory_space<vmem>>, vector<1x32xf32>
    %4 = vector.broadcast %3 : vector<1x32xf32> to vector<64x32xf32>
    %5 = arith.addf %2, %4 : vector<64x32xf32>
    %cst_5 = arith.constant 0.000000e+00 : f32
    %6 = vector.broadcast %cst_5 : f32 to vector<8x32xf32>
    %7 = vector.extract_strided_slice %5 {offsets = [0, 0], sizes = [8, 32], strides = [1, 1]} : vector<64x32xf32> to vector<8x32xf32>
    %c0_6 = arith.constant 0 : index
    %c0_7 = arith.constant 0 : index
    %8 = vector.load %arg2[%c0_6, %c0_7] : memref<32x32xf32, #tpu.memory_space<vmem>>, vector<32x32xf32>
    %cst_8 = arith.constant dense<0.000000e+00> : vector<8x32xf32>
    %9 = tpu.matmul %6, %8, %cst_8 {dimension_numbers = #tpu.dot_dimension_numbers<[1], [0], [0], [1], [0, 0, 1, 1], [], []>} : vector<8x32xf32>, vector<32x32xf32>, vector<8x32xf32> -> vector<8x32xf32>
    %10 = arith.addf %7, %9 : vector<8x32xf32>
    %11 = math.tanh %10 : vector<8x32xf32>
    %12 = vector.extract_strided_slice %5 {offsets = [8, 0], sizes = [8, 32], strides = [1, 1]} : vector<64x32xf32> to vector<8x32xf32>
    %c0_9 = arith.constant 0 : index
    %c0_10 = arith.constant 0 : index
    %13 = vector.load %arg2[%c0_9, %c0_10] : memref<32x32xf32, #tpu.memory_space<vmem>>, vector<32x32xf32>
    %cst_11 = arith.constant dense<0.000000e+00> : vector<8x32xf32>
    %14 = tpu.matmul %11, %13, %cst_11 {dimension_numbers = #tpu.dot_dimension_numbers<[1], [0], [0], [1], [0, 0, 1, 1], [], []>} : vector<8x32xf32>, vector<32x32xf32>, vector<8x32xf32> -> vector<8x32xf32>
    %15 = arith.addf %12, %14 : vector<8x32xf32>
    %16 = math.tanh %15 : vector<8x32xf32>
    %17 = vector.extract_strided_slice %5 {offsets = [16, 0], sizes = [8, 32], strides = [1, 1]} : vector<64x32xf32> to vector<8x32xf32>
    %c0_12 = arith.constant 0 : index
    %c0_13 = arith.constant 0 : index
    %18 = vector.load %arg2[%c0_12, %c0_13] : memref<32x32xf32, #tpu.memory_space<vmem>>, vector<32x32xf32>
    %cst_14 = arith.constant dense<0.000000e+00> : vector<8x32xf32>
    %19 = tpu.matmul %16, %18, %cst_14 {dimension_numbers = #tpu.dot_dimension_numbers<[1], [0], [0], [1], [0, 0, 1, 1], [], []>} : vector<8x32xf32>, vector<32x32xf32>, vector<8x32xf32> -> vector<8x32xf32>
    %20 = arith.addf %17, %19 : vector<8x32xf32>
    %21 = math.tanh %20 : vector<8x32xf32>
    %22 = vector.extract_strided_slice %5 {offsets = [24, 0], sizes = [8, 32], strides = [1, 1]} : vector<64x32xf32> to vector<8x32xf32>
    %c0_15 = arith.constant 0 : index
    %c0_16 = arith.constant 0 : index
    %23 = vector.load %arg2[%c0_15, %c0_16] : memref<32x32xf32, #tpu.memory_space<vmem>>, vector<32x32xf32>
    %cst_17 = arith.constant dense<0.000000e+00> : vector<8x32xf32>
    %24 = tpu.matmul %21, %23, %cst_17 {dimension_numbers = #tpu.dot_dimension_numbers<[1], [0], [0], [1], [0, 0, 1, 1], [], []>} : vector<8x32xf32>, vector<32x32xf32>, vector<8x32xf32> -> vector<8x32xf32>
    %25 = arith.addf %22, %24 : vector<8x32xf32>
    %26 = math.tanh %25 : vector<8x32xf32>
    %27 = vector.extract_strided_slice %5 {offsets = [32, 0], sizes = [8, 32], strides = [1, 1]} : vector<64x32xf32> to vector<8x32xf32>
    %c0_18 = arith.constant 0 : index
    %c0_19 = arith.constant 0 : index
    %28 = vector.load %arg2[%c0_18, %c0_19] : memref<32x32xf32, #tpu.memory_space<vmem>>, vector<32x32xf32>
    %cst_20 = arith.constant dense<0.000000e+00> : vector<8x32xf32>
    %29 = tpu.matmul %26, %28, %cst_20 {dimension_numbers = #tpu.dot_dimension_numbers<[1], [0], [0], [1], [0, 0, 1, 1], [], []>} : vector<8x32xf32>, vector<32x32xf32>, vector<8x32xf32> -> vector<8x32xf32>
    %30 = arith.addf %27, %29 : vector<8x32xf32>
    %31 = math.tanh %30 : vector<8x32xf32>
    %32 = vector.extract_strided_slice %5 {offsets = [40, 0], sizes = [8, 32], strides = [1, 1]} : vector<64x32xf32> to vector<8x32xf32>
    %c0_21 = arith.constant 0 : index
    %c0_22 = arith.constant 0 : index
    %33 = vector.load %arg2[%c0_21, %c0_22] : memref<32x32xf32, #tpu.memory_space<vmem>>, vector<32x32xf32>
    %cst_23 = arith.constant dense<0.000000e+00> : vector<8x32xf32>
    %34 = tpu.matmul %31, %33, %cst_23 {dimension_numbers = #tpu.dot_dimension_numbers<[1], [0], [0], [1], [0, 0, 1, 1], [], []>} : vector<8x32xf32>, vector<32x32xf32>, vector<8x32xf32> -> vector<8x32xf32>
    %35 = arith.addf %32, %34 : vector<8x32xf32>
    %36 = math.tanh %35 : vector<8x32xf32>
    %37 = vector.extract_strided_slice %5 {offsets = [48, 0], sizes = [8, 32], strides = [1, 1]} : vector<64x32xf32> to vector<8x32xf32>
    %c0_24 = arith.constant 0 : index
    %c0_25 = arith.constant 0 : index
    %38 = vector.load %arg2[%c0_24, %c0_25] : memref<32x32xf32, #tpu.memory_space<vmem>>, vector<32x32xf32>
    %cst_26 = arith.constant dense<0.000000e+00> : vector<8x32xf32>
    %39 = tpu.matmul %36, %38, %cst_26 {dimension_numbers = #tpu.dot_dimension_numbers<[1], [0], [0], [1], [0, 0, 1, 1], [], []>} : vector<8x32xf32>, vector<32x32xf32>, vector<8x32xf32> -> vector<8x32xf32>
    %40 = arith.addf %37, %39 : vector<8x32xf32>
    %41 = math.tanh %40 : vector<8x32xf32>
    %42 = vector.extract_strided_slice %5 {offsets = [56, 0], sizes = [8, 32], strides = [1, 1]} : vector<64x32xf32> to vector<8x32xf32>
    %c0_27 = arith.constant 0 : index
    %c0_28 = arith.constant 0 : index
    %43 = vector.load %arg2[%c0_27, %c0_28] : memref<32x32xf32, #tpu.memory_space<vmem>>, vector<32x32xf32>
    %cst_29 = arith.constant dense<0.000000e+00> : vector<8x32xf32>
    %44 = tpu.matmul %41, %43, %cst_29 {dimension_numbers = #tpu.dot_dimension_numbers<[1], [0], [0], [1], [0, 0, 1, 1], [], []>} : vector<8x32xf32>, vector<32x32xf32>, vector<8x32xf32> -> vector<8x32xf32>
    %45 = arith.addf %42, %44 : vector<8x32xf32>
    %46 = math.tanh %45 : vector<8x32xf32>
    %c0_30 = arith.constant 0 : index
    %c0_31 = arith.constant 0 : index
    %47 = vector.load %arg4[%c0_30, %c0_31] : memref<32x5xf32, #tpu.memory_space<vmem>>, vector<32x5xf32>
    %cst_32 = arith.constant dense<0.000000e+00> : vector<8x5xf32>
    %48 = tpu.matmul %46, %47, %cst_32 {dimension_numbers = #tpu.dot_dimension_numbers<[1], [0], [0], [1], [0, 0, 1, 1], [], []>} : vector<8x32xf32>, vector<32x5xf32>, vector<8x5xf32> -> vector<8x5xf32>
    %c0_33 = arith.constant 0 : index
    %c0_34 = arith.constant 0 : index
    %49 = vector.load %arg5[%c0_33, %c0_34] : memref<1x5xf32, #tpu.memory_space<vmem>>, vector<1x5xf32>
    %50 = vector.broadcast %49 : vector<1x5xf32> to vector<8x5xf32>
    %51 = arith.addf %48, %50 : vector<8x5xf32>
    %cst_35 = arith.constant dense<0xFF800000> : vector<8xf32>
    %52 = vector.multi_reduction <maximumf>, %51, %cst_35 [1] : vector<8x5xf32> to vector<8xf32>
    %53 = vector.shape_cast %52 : vector<8xf32> to vector<8x1xf32>
    %54 = vector.broadcast %53 : vector<8x1xf32> to vector<8x5xf32>
    %55 = arith.subf %51, %54 : vector<8x5xf32>
    %56 = math.exp %55 : vector<8x5xf32>
    %cst_36 = arith.constant dense<0.000000e+00> : vector<8xf32>
    %57 = vector.multi_reduction <add>, %56, %cst_36 [1] : vector<8x5xf32> to vector<8xf32>
    %58 = vector.shape_cast %57 : vector<8xf32> to vector<8x1xf32>
    %59 = math.log %58 : vector<8x1xf32>
    %60 = arith.addf %53, %59 : vector<8x1xf32>
    %61 = vector.broadcast %60 : vector<8x1xf32> to vector<8x5xf32>
    %62 = arith.subf %51, %61 : vector<8x5xf32>
    %c0_37 = arith.constant 0 : index
    %c0_38 = arith.constant 0 : index
    %63 = vector.load %arg6[%c0_37, %c0_38] : memref<8x5xf32, #tpu.memory_space<vmem>>, vector<8x5xf32>
    tpu.vector_store %arg6[%c0_37, %c0_38], %62 {strides = array<i32>} : memref<8x5xf32, #tpu.memory_space<vmem>>, vector<8x5xf32>,
    return
  }
}

</mosaic_0001>

<bundles_post_ra>
// kernel: _rnn_forward_impl.1
= control target key start
LH: loop header
LB: loop body
LE: loop exit
PB: predicated region body
PF: predicated region fallthrough
CT: control target
= control target key end

     0   :  { %vm40_vm0 = vcmask 130048   ;;  %v1147_v0 = vmov 0.0|0.0   ;;  %vm1148_vm1 = vmmov 0   ;;  %v1149_v4 = vmov 0.0   ;;  %s1334_s1 = inlined_call_operand.vmem [shape: f32[16,32], index: 1, kind: input, shape index: {}]   ;;  %s1335_s2 = inlined_call_operand.vmem [shape: f32[32,32], index: 2, kind: input, shape index: {}]   ;;  %s1336_s0 = inlined_call_operand.vmem [shape: f32[64,16], index: 0, kind: input, shape index: {}]   ;;  %s1337_s3 = inlined_call_operand.vmem [shape: f32[1,32], index: 3, kind: input, shape index: {}]   ;;  %s1338_s4 = inlined_call_operand.vmem [shape: f32[32,5], index: 4, kind: input, shape index: {}]   ;;  %s1339_s5 = inlined_call_operand.vmem [shape: f32[1,5], index: 5, kind: input, shape index: {}]   ;;  %s1340_s6 = inlined_call_operand.vmem [shape: f32[8,5], index: 6, kind: output, shape index: {}]  }
   0x1   :  { %1070 = vmatprep.subr.bf16.mxu1 %v1147_v0  ;;  %v31_v1 = vld [vmem:[%s1334_s1] sm:$0xff]  ;;  %v32_v2 = vld [vmem:[%s1334_s1 + $0x8] sm:$0xff]  ;;  %975 = vmatprep.mubr.msk.f32.mxu1 %vm1148_vm1, %v1149_v4  ;;  %v172_v9 = vld [vmem:[%s1335_s2 + $0x10] sm:$0xff]  ;;  %vm174_vm2 = vcmask 261120   ;;  %vm859_vm3 = vcmask 39936  }
   0x2   :  { %v170_v3 = vld [vmem:[%s1335_s2] sm:$0xff]  ;;  %v1066_v5 = vpack.c.bf16 %v32_v2, %v31_v1  ;;  %v171_v6 = vld [vmem:[%s1335_s2 + $0x8] sm:$0xff]  ;;  %v173_v10 = vld [vmem:[%s1335_s2 + $0x18] sm:$0xff] }
   0x3   :  { %v23_v7 = vld [vmem:[%s1336_s0] sm:$0xff]  ;;  %v1203_v8 = vpack.c.bf16 %v171_v6, %v170_v3  ;;  %v24_v11 = vld [vmem:[%s1336_s0 + $0x8] sm:$0xff]  ;;  %v1216_v12 = vpack.c.bf16 %v173_v10, %v172_v9  ;;  %v25_v13 = vld [vmem:[%s1336_s0 + $0x10] sm:$0xff] }
   0x4   :  { %955 = vmatprep.mubr.msk.f32.mxu0 %vm40_vm0, %v23_v7  ;;  %1067 = vmatprep.subr.bf16.mxu0 %v1066_v5  ;;  %v1241_v14 = vld [vmem:[%s1337_s3] ss:$0 sm:$0xff]  ;;  %v26_v22 = vld [vmem:[%s1336_s0 + $0x18] sm:$0xff]  ;;  %v28_v24 = vld [vmem:[%s1336_s0 + $0x28] sm:$0xff] }
   0x5   :  { %1072 = vmatpush3.bf16.msra.mxu1 %v1203_v8  ;;  %1069 = vmatpush3.bf16.msra.mxu0 %v1066_v5  ;;  %v27_v23 = vld [vmem:[%s1336_s0 + $0x20] sm:$0xff]  ;;  %v29_v25 = vld [vmem:[%s1336_s0 + $0x30] sm:$0xff]  ;;  %v30_v26 = vld [vmem:[%s1336_s0 + $0x38] sm:$0xff] }
   0x6   :  { %1073 = vmatprep.subr.bf16.mxu1 %v1147_v0  ;;  %1082 = vmatprep.subr.bf16.mxu0 %v1147_v0  ;;  %v775_v63 = vld [vmem:[%s1338_s4] sm:$0xff]  ;;  %v776_v1 = vld [vmem:[%s1338_s4 + $0x8] sm:$0xff]  ;;  %v777_v2 = vld [vmem:[%s1338_s4 + $0x10] sm:$0xff] }
   0x7   :  { %v1119_v3 = vpack.c.bf16 %v776_v1, %v775_v63 }
   0x8   :  { %956 = vmatmul.mubr.msk.f32.vlgmr.msra.gmra.mrb[0].mxu0 %vm40_vm0, %v24_v11  ;;  %v894_v11 = vld [vmem:[%s1339_s5] ss:$0 sm:$0xff] }
   0x9   :  { %1075 = vmatpush3.bf16.msra.mxu1 %v1216_v12  ;;  %1084 = vmatpush3.bf16.msra.mxu0 %v1203_v8 }
   0xa   :  { %1076 = vmatprep.subr.bf16.mxu1 %v1147_v0  ;;  %1085 = vmatprep.subr.bf16.mxu0 %v1147_v0 }
   0xb   :  { %958 = vmatprep.mubr.msk.f32.mxu0 %vm40_vm0, %v25_v13 }
   0xc   :  { %976 = vmatmul.mubr.f32.vlgmr.msra.gmra.mrb[0].mxu1 %v1149_v4  ;;  %959 = vmatmul.mubr.msk.f32.gmra.mrb[2].mxu0 %vm40_vm0, %v26_v22 }
   0xd   :  { %1078 = vmatpush3.bf16.msra.mxu1 %v1203_v8  ;;  %986 = vmatprep.mubr.msk.f32.mxu1 %vm1148_vm1, %v1149_v4 }
   0xe   :  { %1079 = vmatprep.subr.bf16.mxu1 %v1147_v0  ;;  %1087 = vmatpush3.bf16.msra.mxu0 %v1216_v12 }
   0xf   :  { %1094 = vmatprep.subr.bf16.mxu0 %v1147_v0  ;;  %961 = vmatprep.mubr.msk.f32.mxu0 %vm40_vm0, %v27_v23 }
  0x10   :  { %962 = vmatmul.mubr.msk.f32.gmra.mrb[4].mxu0 %vm40_vm0, %v28_v24 }
  0x11   :  { %1081 = vmatpush3.bf16.msra.mxu1 %v1216_v12  ;;  %964 = vmatprep.mubr.msk.f32.mxu0 %vm40_vm0, %v29_v25 }
  0x12   :  { %1088 = vmatprep.subr.bf16.mxu1 %v1147_v0 }
  0x14   :  { %965 = vmatmul.mubr.msk.f32.gmra.mrb[6].mxu0 %vm40_vm0, %v30_v26 }
  0x15   :  { %997 = vmatprep.mubr.msk.f32.mxu0 %vm1148_vm1, %v1149_v4 }
  0xdb   :  { %v957_v15 = vpop.f32.mrb[0].mxu0 }
  0xdc   :  { %v131_v16 = vpop.f32.mrb[1].mxu0  ;;  %v137_v27 = vadd.f32 %v957_v15, %v1241_v14 }
  0xdd   :  { %v132_v17 = vadd.f32 %v1241_v14, %v131_v16 }
  0xdf   :  { %v244_v18 = vpop.f32.mrb[0].mxu1  ;;  %v960_v32 = vpop.f32.mrb[2].mxu0 }
  0xe0   :  { %v248_v19 = vadd.f32 %v244_v18, %v132_v17  ;;  %v977_v20 = vpop.f32.mrb[1].mxu1  ;;  %v141_v33 = vpop.f32.mrb[3].mxu0  ;;  %v147_v43 = vadd.f32 %v960_v32, %v1241_v14 }
  0xe1   :  { %v142_v38 = vadd.f32 %v1241_v14, %v141_v33 }
  0xe2   :  { %1127 = vtanh.f32 %v248_v19 }
  0xe3   :  { %v963_v34 = vpop.f32.mrb[4].mxu0 }
  0xe4   :  { %v151_v35 = vpop.f32.mrb[5].mxu0  ;;  %v157_v53 = vadd.f32 %v963_v34, %v1241_v14 }
  0xe5   :  { %v152_v48 = vadd.f32 %v1241_v14, %v151_v35 }
  0xe7   :  { %v966_v36 = vpop.f32.mrb[6].mxu0 }
  0xe8   :  { %v161_v37 = vpop.f32.mrb[7].mxu0  ;;  %v167_v6 = vadd.f32 %v966_v36, %v1241_v14 }
  0xe9   :  { %v162_v58 = vadd.f32 %v1241_v14, %v161_v37 }
  0xec   :  { %v1128_v21 = vpop.eup %1127 }
  0xed   :  { %987 = vmatmul.mubr.msk.f32.vlgmr.msra.gmra.mrb[2].mxu1 %vm174_vm2, %v1128_v21 }
  0xee   :  { %1090 = vmatpush3.bf16.msra.mxu1 %v1203_v8  ;;  %1008 = vmatprep.mubr.msk.f32.mxu1 %vm1148_vm1, %v1149_v4 }
  0xef   :  { %1091 = vmatprep.subr.bf16.mxu1 %v1147_v0 }
  0xf2   :  { %1093 = vmatpush3.bf16.msra.mxu1 %v1216_v12 }
  0xf3   :  { %1100 = vmatprep.subr.bf16.mxu1 %v1147_v0 }
 0x1c0   :  { %v319_v28 = vpop.f32.mrb[2].mxu1 }
 0x1c1   :  { %v323_v29 = vadd.f32 %v319_v28, %v137_v27  ;;  %v988_v30 = vpop.f32.mrb[3].mxu1 }
 0x1c3   :  { %1129 = vtanh.f32 %v323_v29 }
 0x1cd   :  { %v1130_v31 = vpop.eup %1129 }
 0x1ce   :  { %998 = vmatmul.mubr.msk.f32.vlgmr.msra.gmra.mrb[8].mxu0 %vm174_vm2, %v1130_v31 }
 0x1cf   :  { %1096 = vmatpush3.bf16.msra.mxu0 %v1203_v8  ;;  %1019 = vmatprep.mubr.msk.f32.mxu0 %vm1148_vm1, %v1149_v4 }
 0x1d0   :  { %1097 = vmatprep.subr.bf16.mxu0 %v1147_v0 }
 0x1d3   :  { %1099 = vmatpush3.bf16.msra.mxu0 %v1216_v12 }
 0x1d4   :  { %1106 = vmatprep.subr.bf16.mxu0 %v1147_v0 }
 0x2a1   :  { %v394_v39 = vpop.f32.mrb[8].mxu0 }
 0x2a2   :  { %v398_v40 = vadd.f32 %v394_v39, %v142_v38  ;;  %v999_v41 = vpop.f32.mrb[9].mxu0 }
 0x2a4   :  { %1131 = vtanh.f32 %v398_v40 }
 0x2ae   :  { %v1132_v42 = vpop.eup %1131 }
 0x2af   :  { %1009 = vmatmul.mubr.msk.f32.vlgmr.msra.gmra.mrb[4].mxu1 %vm174_vm2, %v1132_v42 }
 0x2b0   :  { %1102 = vmatpush3.bf16.msra.mxu1 %v1203_v8  ;;  %1030 = vmatprep.mubr.msk.f32.mxu1 %vm1148_vm1, %v1149_v4 }
 0x2b1   :  { %1103 = vmatprep.subr.bf16.mxu1 %v1147_v0 }
 0x2b4   :  { %1105 = vmatpush3.bf16.msra.mxu1 %v1216_v12 }
 0x2b5   :  { %1112 = vmatprep.subr.bf16.mxu1 %v1147_v0 }
 0x382   :  { %v469_v44 = vpop.f32.mrb[4].mxu1 }
 0x383   :  { %v473_v45 = vadd.f32 %v469_v44, %v147_v43  ;;  %v1010_v46 = vpop.f32.mrb[5].mxu1 }
 0x385   :  { %1133 = vtanh.f32 %v473_v45 }
 0x38f   :  { %v1134_v47 = vpop.eup %1133 }
 0x390   :  { %1020 = vmatmul.mubr.msk.f32.vlgmr.msra.gmra.mrb[10].mxu0 %vm174_vm2, %v1134_v47 }
 0x391   :  { %1108 = vmatpush3.bf16.msra.mxu0 %v1203_v8  ;;  %1041 = vmatprep.mubr.msk.f32.mxu0 %vm1148_vm1, %v1149_v4 }
 0x392   :  { %1109 = vmatprep.subr.bf16.mxu0 %v1147_v0 }
 0x395   :  { %1111 = vmatpush3.bf16.msra.mxu0 %v1216_v12 }
 0x396   :  { %1118 = vmatprep.subr.bf16.mxu0 %v1147_v0 }
 0x463   :  { %v544_v49 = vpop.f32.mrb[10].mxu0 }
 0x464   :  { %v548_v50 = vadd.f32 %v544_v49, %v152_v48  ;;  %v1021_v51 = vpop.f32.mrb[11].mxu0 }
 0x466   :  { %1135 = vtanh.f32 %v548_v50 }
 0x470   :  { %v1136_v52 = vpop.eup %1135 }
 0x471   :  { %1031 = vmatmul.mubr.msk.f32.vlgmr.msra.gmra.mrb[6].mxu1 %vm174_vm2, %v1136_v52 }
 0x472   :  { %1114 = vmatpush3.bf16.msra.mxu1 %v1203_v8  ;;  %1052 = vmatprep.mubr.msk.f32.mxu1 %vm1148_vm1, %v1149_v4 }
 0x473   :  { %1115 = vmatprep.subr.bf16.mxu1 %v1147_v0 }
 0x476   :  { %1117 = vmatpush3.bf16.msra.mxu1 %v1216_v12 }
 0x544   :  { %v619_v54 = vpop.f32.mrb[6].mxu1 }
 0x545   :  { %v623_v55 = vadd.f32 %v619_v54, %v157_v53  ;;  %v1032_v56 = vpop.f32.mrb[7].mxu1 }
 0x547   :  { %1137 = vtanh.f32 %v623_v55 }
 0x551   :  { %v1138_v57 = vpop.eup %1137 }
 0x552   :  { %1042 = vmatmul.mubr.msk.f32.vlgmr.msra.gmra.mrb[12].mxu0 %vm174_vm2, %v1138_v57 }
 0x553   :  { %1063 = vmatprep.mubr.msk.f32.mxu0 %vm1148_vm1, %v1149_v4  ;;  %v778_v4 = vld [vmem:[%s1338_s4 + $0x18] sm:$0xff]  ;;  %1120 = vmatpush3.bf16.msra.mxu0 %v1119_v3 }
 0x554   :  { %v1122_v5 = vpack.c.bf16 %v778_v4, %v777_v2  ;;  %1121 = vmatprep.subr.bf16.mxu0 %v1147_v0 }
 0x557   :  { %1123 = vmatpush3.bf16.msra.mxu0 %v1122_v5 }
 0x625   :  { %v694_v59 = vpop.f32.mrb[12].mxu0 }
 0x626   :  { %v698_v60 = vadd.f32 %v694_v59, %v162_v58  ;;  %v1043_v61 = vpop.f32.mrb[13].mxu0 }
 0x628   :  { %1139 = vtanh.f32 %v698_v60 }
 0x632   :  { %v1140_v62 = vpop.eup %1139 }
 0x633   :  { %1053 = vmatmul.mubr.msk.f32.vlgmr.msra.gmra.mrb[8].mxu1 %vm174_vm2, %v1140_v62 }
 0x706   :  { %v769_v7 = vpop.f32.mrb[8].mxu1 }
 0x707   :  { %v773_v8 = vadd.f32 %v769_v7, %v167_v6  ;;  %v1054_v9 = vpop.f32.mrb[9].mxu1 }
 0x709   :  { %1141 = vtanh.f32 %v773_v8 }
 0x713   :  { %v1142_v10 = vpop.eup %1141 }
 0x714   :  { %1064 = vmatmul.mubr.msk.f32.vlgmr.msra.gmra.mrb[14].mxu0 %vm174_vm2, %v1142_v10 }
 0x7e7   :  { %v855_v12 = vpop.f32.mrb[14].mxu0 }
 0x7e8   :  { %v856_v13 = vadd.f32 %v894_v11, %v855_v12  ;;  %v1065_v15 = vpop.f32.mrb[15].mxu0 }
 0x7ea   :  { %v860_v0 = vsel %vm859_vm3, %v856_v13, -inf }
 0x7eb   :  { %861 = vmax.xlane.f32.xlu0 %v860_v0 }
 0x878   :  { %v862_v16 = vpop.xlane.xlu0 %861 }
 0x879   :  { %v863_v14 = vsub.f32 %v856_v13, %v862_v16 }
 0x87b   :  { %v864_v17 = vmul.f32 1.442695, %v863_v14 }
 0x87d   :  { %1143 = vpow2.f32 %v864_v17 }
 0x887   :  { %v1144_v18 = vpop.eup %1143 }
 0x888   :  { %v866_v19 = vsel %vm859_vm3, %v1144_v18, 0.0 }
 0x889   :  { %867 = vadd.xlane.f32.xlu0 %v866_v19 }
 0x916   :  { %v868_v20 = vpop.xlane.xlu0 %867 }
 0x917   :  { %1145 = vlog2.f32 %v868_v20 }
 0x921   :  { %v1146_v21 = vpop.eup %1145 }
 0x922   :  { %v870_v22 = vmul.f32 0.6931472, %v1146_v21 }
 0x924   :  { %v871_v23 = vadd.f32 %v870_v22, %v862_v16 }
 0x926   :  { %v872_v24 = vsub.f32 %v856_v13, %v871_v23 }
 0x928   :  { %873 = vst.msk [vmem:[%s1340_s6] sm:$0xff] %vm859_vm3, %v872_v24 }

</bundles_post_ra>
